<compile_context>
chip_gen: v6e
topology: v6e:2x2x1
jax: 0.10.0
libtpu: 0.0.40
codegen_flags: <defaults>
</compile_context>

<pallas_src>
import jax
import jax.numpy as jnp
from jax.experimental import pallas as pl
from jax.experimental.pallas import tpu as pltpu


def _lr_kernel(x_ref, w_ref, b_ref, o_ref):
    # x_ref: (tb, F) VMEM   w_ref: (1, F) VMEM   b_ref: (1,) SMEM   o_ref: (1, tb) VMEM
    x = x_ref[...]
    w = w_ref[...]
    # (1, F) . (tb, F) contracting F on both sides -> (1, tb).
    # Same contraction pattern as q @ k^T in attention: no transpose is
    # materialized and the result is already lane-dense for the store.
    z = jnp.einsum("of,bf->ob", w, x, preferred_element_type=jnp.float32)
    z = z + b_ref[0]
    o_ref[...] = jax.nn.sigmoid(z).astype(o_ref.dtype)


def _round_up(n, m):
    return ((n + m - 1) // m) * m


def _choose_block_batch(batch, n_features, max_tile_bytes=4 * 1024 * 1024):
    """Largest multiple-of-128 batch tile whose f32 x tile fits the budget."""
    tb = max_tile_bytes // (n_features * 4)
    tb = (tb // 128) * 128
    tb = max(128, min(1024, tb))
    # Don't make the tile (and thus zero padding) bigger than the padded batch.
    tb = min(tb, _round_up(batch, 128))
    return tb


@jax.jit
def lr_forward(x, weight, bias):
    """Pallas implementation of LR.forward: sigmoid(x @ W^T + b).

    x:      (B, F) float32
    weight: (1, F) float32   (torch.nn.Linear(n_features, 1).weight)
    bias:   (1,)   float32   (torch.nn.Linear(n_features, 1).bias)
    returns (B, 1) in x.dtype
    """
    B, F = x.shape
    assert weight.shape == (1, F)
    bias1d = jnp.asarray(bias, dtype=jnp.float32).reshape(1)

    tb = _choose_block_batch(B, F)
    b_pad = _round_up(B, tb)
    x_in = jnp.pad(x, ((0, b_pad - B), (0, 0))) if b_pad != B else x
    grid = (b_pad // tb,)

    out_row = pl.pallas_call(
        _lr_kernel,
        out_shape=jax.ShapeDtypeStruct((1, b_pad), x.dtype),
        grid_spec=pltpu.PrefetchScalarGridSpec(
            num_scalar_prefetch=0,
            grid=grid,
            in_specs=[
                pl.BlockSpec((tb, F), lambda i: (i, 0)),             # x tile (pipelined)
                pl.BlockSpec((1, F), lambda i: (0, 0)),              # weight (resident)
                pl.BlockSpec(memory_space=pltpu.MemorySpace.SMEM),   # bias scalar
            ],
            out_specs=pl.BlockSpec((1, tb), lambda i: (0, i)),       # lane-dense row
        ),
        compiler_params=pltpu.CompilerParams(
            dimension_semantics=("parallel",),
            vmem_limit_bytes=32 * 1024 * 1024,
        ),
    )(x_in, weight, bias1d)

    # (1, B_pad) -> (B, 1): free layout plumbing in the wrapper.
    return out_row.reshape(b_pad, 1)[:B]


def _reference(x, weight, bias):
    return jax.nn.sigmoid(x @ weight.T + bias[None, :])


if __name__ == "__main__":
    key = jax.random.PRNGKey(0)
    kx, kw, kb = jax.random.split(key, 3)

    batch = 8
    n_features = 32

    x = jax.random.normal(kx, (batch, n_features), dtype=jnp.float32)

    # Deterministic parameter init mimicking torch.nn.Linear's
    # U(-1/sqrt(fan_in), 1/sqrt(fan_in)) default.
    bound = 1.0 / jnp.sqrt(jnp.float32(n_features))
    weight = jax.random.uniform(
        kw, (1, n_features), dtype=jnp.float32, minval=-bound, maxval=bound
    )
    bias = jax.random.uniform(
        kb, (1,), dtype=jnp.float32, minval=-bound, maxval=bound
    )

    out = jax.block_until_ready(lr_forward(x, weight, bias))
    ref = _reference(x, weight, bias)

    assert out.shape == (batch, 1), out.shape
    assert jnp.allclose(out, ref, atol=1e-5, rtol=1e-5), (out, ref)

    print("KERNEL_OK")
</pallas_src>

<mosaic_0001>
module attributes {stable_mosaic.version = 11 : i64} {
  func.func @_lr_kernel(%arg0: i32, %arg1: memref<128x32xf32, #tpu.memory_space<vmem>>, %arg2: memref<1x32xf32, #tpu.memory_space<vmem>>, %arg3: memref<1xf32, #tpu.memory_space<smem>>, %arg4: memref<1x128xf32, #tpu.memory_space<vmem>>) attributes {dimension_semantics = [#tpu.dimension_semantics<parallel>], iteration_bounds = array<i64: 1>, scalar_prefetch = 0 : i64, scratch_operands = 0 : i64, tpu.core_type = #tpu.core_type<tc>, window_params = [{transform_indices = @transform_0, window_bounds = array<i64: 128, 32>}, {pipeline_mode = #tpu.pipeline_mode<synchronous>, transform_indices = @transform_1, window_bounds = array<i64: 1, 32>}, {transform_indices = @transform_2, window_bounds = array<i64: 1>}, {transform_indices = @transform_3, window_bounds = array<i64: 1, 128>}]} {
    %c0 = arith.constant 0 : index
    %c0_0 = arith.constant 0 : index
    %0 = vector.load %arg1[%c0, %c0_0] : memref<128x32xf32, #tpu.memory_space<vmem>>, vector<128x32xf32>
    %c0_1 = arith.constant 0 : index
    %c0_2 = arith.constant 0 : index
    %1 = vector.load %arg2[%c0_1, %c0_2] : memref<1x32xf32, #tpu.memory_space<vmem>>, vector<1x32xf32>
    "tpu.trace_start"() <{level = 10 : i32, message = "of,bf->ob"}> : () -> ()
    %cst = arith.constant dense<0.000000e+00> : vector<1x128xf32>
    %2 = tpu.matmul %1, %0, %cst {dimension_numbers = #tpu.dot_dimension_numbers<[1], [1], [0], [0], [0, 0, 1, 0], [], []>} : vector<1x32xf32>, vector<128x32xf32>, vector<1x128xf32> -> vector<1x128xf32>
    "tpu.trace_stop"() : () -> ()
    %c0_3 = arith.constant 0 : index
    %3 = memref.load %arg3[%c0_3] : memref<1xf32, #tpu.memory_space<smem>>
    %4 = vector.broadcast %3 : f32 to vector<1x128xf32>
    %5 = arith.addf %2, %4 : vector<1x128xf32>
    %6 = arith.negf %5 : vector<1x128xf32>
    %7 = math.exp %6 : vector<1x128xf32>
    %cst_4 = arith.constant 1.000000e+00 : f32
    %8 = vector.broadcast %cst_4 : f32 to vector<1x128xf32>
    %9 = arith.addf %8, %7 : vector<1x128xf32>
    %10 = arith.divf %8, %9 : vector<1x128xf32>
    %c0_5 = arith.constant 0 : index
    %c0_6 = arith.constant 0 : index
    %11 = vector.load %arg4[%c0_5, %c0_6] : memref<1x128xf32, #tpu.memory_space<vmem>>, vector<1x128xf32>
    tpu.vector_store %arg4[%c0_5, %c0_6], %10 {strides = array<i32>} : memref<1x128xf32, #tpu.memory_space<vmem>>, vector<1x128xf32>,
    return
  }
  func.func @transform_0(%arg0: i32) -> (i32, i32) {
    %c0_i32 = arith.constant 0 : i32
    %c0_i32_0 = arith.constant 0 : i32
    return %arg0, %c0_i32 : i32, i32
  }
  func.func @transform_1(%arg0: i32) -> (i32, i32) {
    %c0_i32 = arith.constant 0 : i32
    %c0_i32_0 = arith.constant 0 : i32
    %c0_i32_1 = arith.constant 0 : i32
    return %c0_i32, %c0_i32_0 : i32, i32
  }
  func.func @transform_2(%arg0: i32) -> i32 {
    %c0_i32 = arith.constant 0 : i32
    %c0_i32_0 = arith.constant 0 : i32
    return %c0_i32 : i32
  }
  func.func @transform_3(%arg0: i32) -> (i32, i32) {
    %c0_i32 = arith.constant 0 : i32
    %c0_i32_0 = arith.constant 0 : i32
    return %c0_i32, %arg0 : i32, i32
  }
}

</mosaic_0001>

<bundles_post_ra>
// kernel: lr_forward.1
= control target key start
LH: loop header
LB: loop body
LE: loop exit
PB: predicated region body
PF: predicated region fallthrough
CT: control target
= control target key end

     0   :  { %vm34_vm0 = vcmask 261120   ;;  %v243_v0 = vmov 0.0   ;;  %vm244_vm1 = vmmov 0   ;;  %s339_s0 = inlined_call_operand.vmem [shape: f32[128,32], index: 0, kind: input, shape index: {}]   ;;  %s340_s1 = inlined_call_operand.vmem [shape: f32[1,32], index: 1, kind: input, shape index: {}]   ;;  %s341_s2 = inlined_call_operand.<no memory space> [shape: f32[1], index: 2, kind: input, shape index: {}]   ;;  %s342_s3 = inlined_call_operand.vmem [shape: f32[1,128], index: 3, kind: output, shape index: {}]  }
   0x1   :  { %202 = vmatprep.subr.mxu0 %v243_v0  ;;  %v30_v1 = vld [vmem:[%s339_s0 + $0x78] sm:$0xff]  ;;  %234 = vmatprep.mubr.msk.f32.mxu0 %vm244_vm1, %v243_v0  ;;  %v29_v2 = vld [vmem:[%s339_s0 + $0x70] sm:$0xff]  ;;  %v28_v3 = vld [vmem:[%s339_s0 + $0x68] sm:$0xff]  ;;  %v33_v18 = vstv %s341_s2 }
   0x2   :  { %203 = vmatpush3.xpose.msk.msra.mxu0 %vm34_vm0, %v30_v1  ;;  %v27_v4 = vld [vmem:[%s339_s0 + $0x60] sm:$0xff]  ;;  %v26_v5 = vld [vmem:[%s339_s0 + $0x58] sm:$0xff]  ;;  %v25_v6 = vld [vmem:[%s339_s0 + $0x50] sm:$0xff] }
   0x3   :  { %204 = vmatprep.subr.mxu0 %v243_v0  ;;  %v24_v7 = vld [vmem:[%s339_s0 + $0x48] sm:$0xff]  ;;  %v23_v8 = vld [vmem:[%s339_s0 + $0x40] sm:$0xff]  ;;  %v22_v9 = vld [vmem:[%s339_s0 + $0x38] sm:$0xff] }
   0x4   :  { %v21_v10 = vld [vmem:[%s339_s0 + $0x30] sm:$0xff]  ;;  %v20_v11 = vld [vmem:[%s339_s0 + $0x28] sm:$0xff]  ;;  %v19_v12 = vld [vmem:[%s339_s0 + $0x20] sm:$0xff] }
   0x5   :  { %v18_v13 = vld [vmem:[%s339_s0 + $0x18] sm:$0xff]  ;;  %v17_v14 = vld [vmem:[%s339_s0 + $0x10] sm:$0xff]  ;;  %v16_v15 = vld [vmem:[%s339_s0 + $0x8] sm:$0xff] }
   0x6   :  { %205 = vmatpush3.xpose.msk.msra.mxu0 %vm34_vm0, %v29_v2  ;;  %v15_v16 = vld [vmem:[%s339_s0] sm:$0xff] }
   0x7   :  { %206 = vmatprep.subr.mxu0 %v243_v0  ;;  %v31_v17 = vld [vmem:[%s340_s1] sm:$0x1] }
   0xa   :  { %207 = vmatpush3.xpose.msk.msra.mxu0 %vm34_vm0, %v28_v3 }
   0xb   :  { %208 = vmatprep.subr.mxu0 %v243_v0 }
   0xe   :  { %209 = vmatpush3.xpose.msk.msra.mxu0 %vm34_vm0, %v27_v4 }
   0xf   :  { %210 = vmatprep.subr.mxu0 %v243_v0 }
  0x12   :  { %211 = vmatpush3.xpose.msk.msra.mxu0 %vm34_vm0, %v26_v5 }
  0x13   :  { %212 = vmatprep.subr.mxu0 %v243_v0 }
  0x16   :  { %213 = vmatpush3.xpose.msk.msra.mxu0 %vm34_vm0, %v25_v6 }
  0x17   :  { %214 = vmatprep.subr.mxu0 %v243_v0 }
  0x1a   :  { %215 = vmatpush3.xpose.msk.msra.mxu0 %vm34_vm0, %v24_v7 }
  0x1b   :  { %216 = vmatprep.subr.mxu0 %v243_v0 }
  0x1e   :  { %217 = vmatpush3.xpose.msk.msra.mxu0 %vm34_vm0, %v23_v8 }
  0x1f   :  { %218 = vmatprep.subr.mxu0 %v243_v0 }
  0x22   :  { %219 = vmatpush3.xpose.msk.msra.mxu0 %vm34_vm0, %v22_v9 }
  0x23   :  { %220 = vmatprep.subr.mxu0 %v243_v0 }
  0x26   :  { %221 = vmatpush3.xpose.msk.msra.mxu0 %vm34_vm0, %v21_v10 }
  0x27   :  { %222 = vmatprep.subr.mxu0 %v243_v0 }
  0x2a   :  { %223 = vmatpush3.xpose.msk.msra.mxu0 %vm34_vm0, %v20_v11 }
  0x2b   :  { %224 = vmatprep.subr.mxu0 %v243_v0 }
  0x2e   :  { %225 = vmatpush3.xpose.msk.msra.mxu0 %vm34_vm0, %v19_v12 }
  0x2f   :  { %226 = vmatprep.subr.mxu0 %v243_v0 }
  0x32   :  { %227 = vmatpush3.xpose.msk.msra.mxu0 %vm34_vm0, %v18_v13 }
  0x33   :  { %228 = vmatprep.subr.mxu0 %v243_v0 }
  0x36   :  { %229 = vmatpush3.xpose.msk.msra.mxu0 %vm34_vm0, %v17_v14 }
  0x37   :  { %230 = vmatprep.subr.mxu0 %v243_v0 }
  0x3a   :  { %231 = vmatpush3.xpose.msk.msra.mxu0 %vm34_vm0, %v16_v15 }
  0x3b   :  { %232 = vmatprep.subr.mxu0 %v243_v0 }
  0x3e   :  { %233 = vmatpush3.xpose.msk.msra.mxu0 %vm34_vm0, %v15_v16 }
  0x41   :  { %235 = vmatmul.mubr.msk.f32.vlgmr.msra.gmra.mxu0 %vm34_vm0, %v31_v17 }
 0x101   :  { %v152_v19 = vpop.f32.mrf.mxu0 }
 0x102   :  { %v153_v20 = vadd.f32 %v152_v19, %v33_v18 }
 0x103   :  { %v236_v21 = vpop.f32.mrf.mxu0 }
 0x104   :  { %v184_v22 = vmul.f32 -1.442695, %v153_v20 }
 0x106   :  { %239 = vpow2.f32 %v184_v22 }
 0x113   :  { %v240_v23 = vpop.eup %239 }
 0x114   :  { %v159_v24 = vadd.f32 1.0, %v240_v23 }
 0x116   :  { %241 = vrcp.f32 %v159_v24 }
 0x123   :  { %v242_v25 = vpop.eup %241 }
 0x124   :  { %162 = vst [vmem:[%s342_s3] sm:$0x1] %v242_v25 }

</bundles_post_ra>
